<compile_context>
chip_gen: v7x
topology: tpu7x:2x2x1
jax: 0.10.0
libtpu: 0.0.40
codegen_flags: <defaults>
</compile_context>

<pallas_src>
import jax
import jax.numpy as jnp
from jax.experimental import pallas as pl
from jax.experimental.pallas import tpu as pltpu

_F32_MIN = float(jnp.finfo(jnp.float32).min)
_F32_MAX = float(jnp.finfo(jnp.float32).max)
_TARGET_TILE_BYTES = 8 * 1024 * 1024          # ~8 MiB x-tile per grid step


# ---------------------------------------------------------------------------
# static tile-size selection
# ---------------------------------------------------------------------------
def _sentinels(dtype):
    fin = (jnp.finfo(dtype) if jnp.issubdtype(dtype, jnp.floating)
           else jnp.finfo(jnp.float32))
    return float(fin.min), float(fin.max)


def _sublane_align(dtype):
    # f32 -> 8, bf16 -> 16, int8/fp8 -> 32 (packed-dtype minimum tiles)
    return max(8, 32 // jnp.dtype(dtype).itemsize)


def _pick_batch_tile(B, dtype):
    # Cap the batch tile (8/16/32 rows by dtype) so blocks stay bounded; either
    # Bt == B (full dim) or Bt is a multiple of 8 -> always a legal block dim.
    cap = {4: 8, 2: 16, 1: 32}.get(jnp.dtype(dtype).itemsize, 8)
    return B if B <= cap else cap


def _pick_lane_tile(n, max_lanes=2048):
    # Lane-axis tiling: multiples of 128 (block constraint), >=2 tiles so both
    # v7x TensorCores get 'parallel' work; full axis when not 128-divisible.
    if n % 128 != 0 or n <= 128:
        return n
    return min(((n // 128) + 1) // 2, max_lanes // 128) * 128


def _pick_reduce_tile(n, bytes_per_reduce_row, align, target_bytes):
    # Largest multiple of `align` whose block stays near target_bytes.  The grid
    # uses pl.cdiv, and a partial tail is masked in-kernel, so no divisor (and
    # no whole-axis fallback) is ever required.
    t = (target_bytes // max(1, bytes_per_reduce_row)) // align * align
    t = max(t, align)
    return n if t >= n else t


# ---------------------------------------------------------------------------
# kernel factory (shared by the 3D mid-axis and 4D last-axis paths)
# ---------------------------------------------------------------------------
def _make_reduce_kernel(op, has_mask, sent_min, sent_max, *,
                        reduce_axis, reduce_tile, reduce_size,
                        need_tail_mask, assume_finite):
    """NaN-aware masked reduction over `reduce_axis` of the current block.

    Grid layout: (parallel, parallel, reduce); the reduce axis is grid axis 2.
    f32 VMEM scratch accumulators are initialized at step 0 and stored at the
    last step (output BlockSpec revisits the same tile across the reduce axis).
    """

    def kernel(*refs):
        i = 0
        x_ref = refs[i]; i += 1
        m_ref = None
        if has_mask:
            m_ref = refs[i]; i += 1
        o_ref = refs[i]; i += 1
        acc_ref = refs[i]; i += 1
        cnt_ref = refs[i] if op == "mean" else None

        step = pl.program_id(2)

        @pl.when(step == 0)
        def _init():
            if op == "max":
                acc_ref[...] = jnp.full(acc_ref.shape, sent_min, jnp.float32)
            elif op == "min":
                acc_ref[...] = jnp.full(acc_ref.shape, sent_max, jnp.float32)
            else:  # mean
                acc_ref[...] = jnp.zeros(acc_ref.shape, jnp.float32)
                cnt_ref[...] = jnp.zeros(cnt_ref.shape, jnp.float32)

        x = x_ref[...].astype(jnp.float32)      # in-vreg upcast; accum stays f32

        valid = None
        if not assume_finite:
            valid = x == x                      # False exactly at NaN positions
        if has_mask:
            keep = jnp.broadcast_to(m_ref[...] > 0, x.shape)   # lane-broadcast
            valid = keep if valid is None else jnp.logical_and(valid, keep)
        if need_tail_mask:                      # cdiv tail of the reduce axis
            pos = (step * reduce_tile +
                   jax.lax.broadcasted_iota(jnp.int32, x.shape, reduce_axis))
            inb = pos < reduce_size
            valid = inb if valid is None else jnp.logical_and(valid, inb)

        if op == "max":
            xm = x if valid is None else jnp.where(valid, x, sent_min)
            acc_ref[...] = jnp.maximum(acc_ref[...], jnp.max(xm, axis=reduce_axis))
        elif op == "min":
            xm = x if valid is None else jnp.where(valid, x, sent_max)
            acc_ref[...] = jnp.minimum(acc_ref[...], jnp.min(xm, axis=reduce_axis))
        else:  # mean
            if valid is None:
                acc_ref[...] += jnp.sum(x, axis=reduce_axis)
                cnt_ref[...] += float(x.shape[reduce_axis])
            else:
                acc_ref[...] += jnp.sum(jnp.where(valid, x, 0.0), axis=reduce_axis)
                cnt_ref[...] += jnp.sum(valid.astype(jnp.float32), axis=reduce_axis)

        @pl.when(step == pl.num_programs(2) - 1)
        def _finalize():
            if op == "mean":
                # exact divide: once per output tile, off the critical path;
                # 0/0 -> NaN for fully-masked rows (matches torch.nanmean).
                o_ref[...] = (acc_ref[...] / cnt_ref[...]).astype(o_ref.dtype)
            else:
                o_ref[...] = acc_ref[...].astype(o_ref.dtype)

    return kernel


# ---------------------------------------------------------------------------
# pallas_call wrappers
# ---------------------------------------------------------------------------
def _vmem_limit(block_bytes, scratch_bytes):
    est = 2 * block_bytes + scratch_bytes + (4 << 20)      # double-buffer + margin
    return int(min(max(est, 32 << 20), 100 << 20))


def _pool_mid_axis(x, mask, op, *, assume_finite=False,
                   target_bytes=_TARGET_TILE_BYTES):
    """x: [B,S,H] (native dtype); mask: None, [B,S,1] or [B,S,H] -> out [B,H]."""
    B, S, H = x.shape
    dtype = x.dtype
    itemsize = jnp.dtype(dtype).itemsize
    sent_min, sent_max = _sentinels(dtype)

    Bt = _pick_batch_tile(B, dtype)
    TH = _pick_lane_tile(H)
    align = _sublane_align(dtype)

    has_mask = mask is not None
    mask_rowwise = has_mask and mask.shape[-1] == 1
    m_item = jnp.dtype(mask.dtype).itemsize if has_mask else 0
    m_lanes = (1 if mask_rowwise else TH)

    row_bytes = Bt * TH * itemsize + (Bt * m_lanes * m_item if has_mask else 0)
    TS = _pick_reduce_tile(S, row_bytes, align, target_bytes)
    need_tail = (S % TS) != 0
    grid = (pl.cdiv(B, Bt), pl.cdiv(H, TH), pl.cdiv(S, TS))

    in_specs = [pl.BlockSpec((Bt, TS, TH), lambda b, h, s: (b, s, h))]
    inputs = [x]
    if has_mask:
        if mask_rowwise:
            in_specs.append(pl.BlockSpec((Bt, TS, 1), lambda b, h, s: (b, s, 0)))
        else:
            in_specs.append(pl.BlockSpec((Bt, TS, TH), lambda b, h, s: (b, s, h)))
        inputs.append(mask)

    scratch = [pltpu.VMEM((Bt, TH), jnp.float32)]
    if op == "mean":
        scratch.append(pltpu.VMEM((Bt, TH), jnp.float32))

    block_bytes = (Bt * TS * TH * itemsize
                   + (Bt * TS * m_lanes * m_item if has_mask else 0)
                   + Bt * TH * itemsize)
    scratch_bytes = len(scratch) * Bt * TH * 4

    kernel = _make_reduce_kernel(op, has_mask, sent_min, sent_max,
                                 reduce_axis=1, reduce_tile=TS, reduce_size=S,
                                 need_tail_mask=need_tail,
                                 assume_finite=assume_finite)
    return pl.pallas_call(
        kernel,
        out_shape=jax.ShapeDtypeStruct((B, H), dtype),
        grid_spec=pltpu.PrefetchScalarGridSpec(
            num_scalar_prefetch=0,
            grid=grid,
            in_specs=in_specs,
            out_specs=pl.BlockSpec((Bt, TH), lambda b, h, s: (b, h)),
            scratch_shapes=scratch),
        compiler_params=pltpu.CompilerParams(
            dimension_semantics=("parallel", "parallel", "arbitrary"),
            vmem_limit_bytes=_vmem_limit(block_bytes, scratch_bytes)),
    )(*inputs)


def _pool_last_axis(x, mask, op, *, assume_finite=False,
                    target_bytes=_TARGET_TILE_BYTES):
    """x: [B,C,R] (native dtype); mask: None or [B,C,R] -> out [B,C]."""
    B, C, R = x.shape
    dtype = x.dtype
    itemsize = jnp.dtype(dtype).itemsize
    sent_min, sent_max = _sentinels(dtype)

    Bt = _pick_batch_tile(B, dtype)
    Ct = _pick_lane_tile(C)

    has_mask = mask is not None
    m_item = jnp.dtype(mask.dtype).itemsize if has_mask else 0

    col_bytes = Bt * Ct * (itemsize + (m_item if has_mask else 0))
    Rt = _pick_reduce_tile(R, col_bytes, 128, target_bytes)
    need_tail = (R % Rt) != 0
    grid = (pl.cdiv(B, Bt), pl.cdiv(C, Ct), pl.cdiv(R, Rt))

    in_specs = [pl.BlockSpec((Bt, Ct, Rt), lambda b, c, r: (b, c, r))]
    inputs = [x]
    if has_mask:
        in_specs.append(pl.BlockSpec((Bt, Ct, Rt), lambda b, c, r: (b, c, r)))
        inputs.append(mask)

    scratch = [pltpu.VMEM((Bt, Ct), jnp.float32)]
    if op == "mean":
        scratch.append(pltpu.VMEM((Bt, Ct), jnp.float32))

    block_bytes = (Bt * Ct * Rt * (itemsize + (m_item if has_mask else 0))
                   + Bt * Ct * itemsize)
    scratch_bytes = len(scratch) * Bt * Ct * 4

    kernel = _make_reduce_kernel(op, has_mask, sent_min, sent_max,
                                 reduce_axis=2, reduce_tile=Rt, reduce_size=R,
                                 need_tail_mask=need_tail,
                                 assume_finite=assume_finite)
    return pl.pallas_call(
        kernel,
        out_shape=jax.ShapeDtypeStruct((B, C), dtype),
        grid_spec=pltpu.PrefetchScalarGridSpec(
            num_scalar_prefetch=0,
            grid=grid,
            in_specs=in_specs,
            out_specs=pl.BlockSpec((Bt, Ct), lambda b, c, r: (b, c)),
            scratch_shapes=scratch),
        compiler_params=pltpu.CompilerParams(
            dimension_semantics=("parallel", "parallel", "arbitrary"),
            vmem_limit_bytes=_vmem_limit(block_bytes, scratch_bytes)),
    )(*inputs)


# ---------------------------------------------------------------------------
# module wrapper
# ---------------------------------------------------------------------------
def _nan_masked(x, mask):
    # torch: tensor[~mask.bool()] = nan ; mask indexes the leading dims of x.
    mask = jnp.asarray(mask).astype(bool)
    keep = mask.reshape(mask.shape + (1,) * (x.ndim - mask.ndim))
    return jnp.where(keep, x, jnp.asarray(jnp.nan, x.dtype))


class PoolingOP:
    """JAX/Pallas equivalent of TorchPoolingOP."""

    SUPPORTED = ("min", "max", "mean", "last", "all")
    # TODO(synk): 'median' (torch.nanmedian) needs a per-row selection/sort
    # network; no clean Pallas TPU equivalent here, so it is not implemented.

    def __init__(self, op_name, dim, assume_finite=False):
        assert op_name in self.SUPPORTED, op_name
        self.name = op_name
        self.dim = dim
        self.assume_finite = assume_finite

    def __call__(self, tensor, attention_mask=None):
        if self.name == "all":
            return tensor

        # Resolve the pooled dimension exactly like the PyTorch forward.
        if self.dim == "auto":
            if tensor.ndim == 2:
                # torch mutates the input with NaNs before this early return.
                return (_nan_masked(tensor, attention_mask)
                        if attention_mask is not None else tensor)
            elif tensor.ndim == 3:
                dim = 1
            elif tensor.ndim == 4:
                dim = (2, 3)
            else:
                raise RuntimeError(
                    f"Tensor shape {tensor.shape} not supported in pooling op auto mode.")
        else:
            dim = 1

        if self.name == "last":
            if isinstance(dim, tuple):
                raise RuntimeError("'last' pooling not defined for tuple dims.")
            t = (_nan_masked(tensor, attention_mask)
                 if attention_mask is not None else tensor)
            return jnp.take(t, t.shape[dim] - 1, axis=dim)

        if isinstance(dim, tuple):              # 4D 'auto': pool over (2, 3)
            return self._pool_hw(tensor, attention_mask)
        return self._pool_dim1(tensor, attention_mask)

    # --- pool over dim 1 (any rank >= 2) --------------------------------------
    def _pool_dim1(self, x, mask):
        B, S = x.shape[0], x.shape[1]
        trailing = tuple(x.shape[2:])
        H = 1
        for d in trailing:
            H *= d
        x3 = x.reshape(B, S, H)

        m = None
        if mask is not None:
            mask = jnp.asarray(mask)
            m_dtype = x.dtype if jnp.issubdtype(x.dtype, jnp.floating) else jnp.float32
            if mask.ndim == 2 and mask.shape == (B, S):
                # compact per-row mask, broadcast across the feature axis in-kernel
                m = mask.astype(m_dtype).reshape(B, S, 1)
            elif mask.shape == x.shape:
                m = mask.astype(m_dtype).reshape(B, S, H)      # elementwise (rare)
            else:
                raise RuntimeError(
                    f"attention_mask shape {mask.shape} unsupported for tensor {x.shape}.")

        out = _pool_mid_axis(x3, m, self.name, assume_finite=self.assume_finite)
        return out.reshape((B,) + trailing)

    # --- 4D NCHW, pool over (2, 3) --------------------------------------------
    def _pool_hw(self, x, mask):
        B, C, Hs, Ws = x.shape
        x3 = x.reshape(B, C, Hs * Ws)           # contiguous trailing dims: free
        sent_min, sent_max = _sentinels(x.dtype)

        if mask is None:
            return _pool_last_axis(x3, None, self.name,
                                   assume_finite=self.assume_finite)

        mask = jnp.asarray(mask)
        if mask.ndim <= 2:
            # torch bool-indexing with a leading-dims mask NaNs whole (Hs,Ws)
            # maps: equivalent to unmasked pooling + post-fill (zero mask traffic).
            pooled = _pool_last_axis(x3, None, self.name,
                                     assume_finite=self.assume_finite)
            keep = mask.astype(bool)
            if mask.ndim == 1:
                keep = keep[:, None]
            fill = {"max": sent_min, "min": sent_max,
                    "mean": float("nan")}[self.name]
            return jnp.where(keep, pooled, jnp.asarray(fill, pooled.dtype))

        # Elementwise mask (rare): carried in x's dtype (no int32 inflation).
        m_dtype = x.dtype if jnp.issubdtype(x.dtype, jnp.floating) else jnp.float32
        if mask.ndim == 3:
            m = jnp.broadcast_to(mask.astype(m_dtype)[..., None], x.shape)
        else:
            m = mask.astype(m_dtype)
        m = m.reshape(B, C, Hs * Ws)
        return _pool_last_axis(x3, m, self.name,
                               assume_finite=self.assume_finite)


# ---------------------------------------------------------------------------
# pure-JAX reference + self-test
# ---------------------------------------------------------------------------
def _ref_pool(x, keep, op, axis):
    """keep: bool mask broadcastable to x.shape (True = valid) or None."""
    lo, hi = _sentinels(x.dtype)
    xf = x.astype(jnp.float32)
    valid = jnp.logical_not(jnp.isnan(xf))
    if keep is not None:
        valid = jnp.logical_and(valid, keep)
    if op == "max":
        return jnp.max(jnp.where(valid, xf, lo), axis=axis)
    if op == "min":
        return jnp.min(jnp.where(valid, xf, hi), axis=axis)
    s = jnp.sum(jnp.where(valid, xf, 0.0), axis=axis)
    c = jnp.sum(valid.astype(jnp.float32), axis=axis)
    return s / c


if __name__ == "__main__":
    key = jax.random.PRNGKey(0)
    ks = jax.random.split(key, 6)
    ok = True

    def close(a, b, tol):
        return bool(jnp.allclose(jnp.asarray(a, jnp.float32),
                                 jnp.asarray(b, jnp.float32),
                                 rtol=tol, atol=tol, equal_nan=True))

    # ---- 3D [B,S,H] = [2,8,32], 'auto' pooled over S, per-row mask ----------
    B, S, H = 2, 8, 32
    x3 = jax.random.normal(ks[0], (B, S, H), jnp.float32)
    x3 = x3.at[0, 2, :5].set(jnp.nan)                       # NaN-aware reduction
    am = (jax.random.uniform(ks[1], (B, S)) > 0.3).astype(jnp.int32)
    am = am.at[:, 0].set(1)                                  # >=1 valid pos per row
    keep3 = am.astype(bool)[:, :, None]

    for op in ("max", "min", "mean"):
        out = jax.block_until_ready(PoolingOP(op, "auto")(x3, am))
        ok &= out.shape == (B, H) and close(out, _ref_pool(x3, keep3, op, 1), 1e-4)

    # native-dtype path: bf16 stays bf16 in HBM, f32 accumulation in-kernel
    xb = x3.astype(jnp.bfloat16)
    for op in ("max", "mean"):
        out = jax.block_until_ready(PoolingOP(op, "auto")(xb, am))
        ok &= out.dtype == jnp.bfloat16
        ok &= close(out, _ref_pool(xb, keep3, op, 1), 2e-2)

    # ---- 4D NCHW [2,4,16,16], 'auto' pooled over (2,3) ----------------------
    Bc, C, Hs, Ws = 2, 4, 16, 16
    x4 = jax.random.normal(ks[2], (Bc, C, Hs, Ws), jnp.float32)
    mask_bc = jnp.ones((Bc, C), jnp.int32).at[1, 3].set(0)   # mask one whole map
    keep4 = mask_bc.astype(bool)[:, :, None, None]

    for op in ("max", "min", "mean"):
        out = jax.block_until_ready(PoolingOP(op, "auto")(x4, mask_bc))
        ok &= out.shape == (Bc, C) and close(out, _ref_pool(x4, keep4, op, (2, 3)), 1e-4)
    for op in ("max", "mean"):                               # unmasked 4D path
        out = jax.block_until_ready(PoolingOP(op, "auto")(x4))
        ok &= close(out, _ref_pool(x4, None, op, (2, 3)), 1e-4)

    # ---- tiled / partial-tail paths (tiny target forces real multi-tile grids)
    Bp, Sp, Hp = 10, 50, 256       # Bt=8 (partial batch), TH=128 (2 tiles), TS=8 (tail)
    xp = jax.random.normal(ks[3], (Bp, Sp, Hp), jnp.float32)
    xp = xp.at[1, 5, :17].set(jnp.nan)
    amp = (jax.random.uniform(ks[4], (Bp, Sp)) > 0.25).astype(jnp.int32)
    amp = amp.at[:, 0].set(1)
    mp = amp.astype(xp.dtype).reshape(Bp, Sp, 1)
    keepp = amp.astype(bool)[:, :, None]
    for op in ("max", "mean"):
        out = jax.block_until_ready(_pool_mid_axis(xp, mp, op, target_bytes=4096))
        ok &= out.shape == (Bp, Hp) and close(out, _ref_pool(xp, keepp, op, 1), 1e-4)

    Bq, Cq, Rq = 2, 256, 324       # Ct=128 (2 tiles), Rt=128 (tail=68), elementwise mask
    xq = jax.random.normal(ks[5], (Bq, Cq, Rq), jnp.float32)
    mq = (jax.random.uniform(jax.random.PRNGKey(7), (Bq, Cq, Rq)) > 0.2).astype(xq.dtype)
    mq = mq.at[:, :, 0].set(1.0)
    for op in ("min", "mean"):
        out = jax.block_until_ready(_pool_last_axis(xq, mq, op, target_bytes=4096))
        ok &= out.shape == (Bq, Cq) and close(out, _ref_pool(xq, mq.astype(bool), op, 2), 1e-4)

    # ---- glue-only ops + explicit-dim fall-through ---------------------------
    out_last = jax.block_until_ready(PoolingOP("last", "auto")(x3, am))
    ref_last = jnp.where(keep3, x3, jnp.nan)[:, -1, :]
    ok &= out_last.shape == (B, H) and close(out_last, ref_last, 1e-6)
    ok &= PoolingOP("all", "auto")(x3).shape == (B, S, H)
    ok &= PoolingOP("mean", "auto")(x3[:, :, 0]).shape == (B, S)   # 2D auto identity

    out_d = jax.block_until_ready(PoolingOP("max", 2)(x4))          # explicit dim -> dim=1
    ok &= out_d.shape == (Bc, Hs, Ws) and close(out_d, _ref_pool(x4, None, "max", 1), 1e-4)

    if ok:
        print("KERNEL_OK")
    else:
        raise SystemExit("mismatch vs reference")
</pallas_src>

<mosaic_0001>
module attributes {stable_mosaic.version = 11 : i64} {
  func.func @kernel(%arg0: i32, %arg1: i32, %arg2: i32, %arg3: memref<2x8x32xf32, #tpu.memory_space<vmem>>, %arg4: memref<2x8x1xf32, #tpu.memory_space<vmem>>, %arg5: memref<2x32xf32, #tpu.memory_space<vmem>>, %arg6: memref<2x32xf32, #tpu.memory_space<vmem>>) attributes {dimension_semantics = [#tpu.dimension_semantics<parallel>, #tpu.dimension_semantics<parallel>, #tpu.dimension_semantics<arbitrary>], iteration_bounds = array<i64: 1, 1, 1>, scalar_prefetch = 0 : i64, scratch_operands = 1 : i64, tpu.core_type = #tpu.core_type<tc>, window_params = [{transform_indices = @transform_0, window_bounds = array<i64: 2, 8, 32>}, {transform_indices = @transform_1, window_bounds = array<i64: 2, 8, 1>}, {transform_indices = @transform_2, window_bounds = array<i64: 2, 32>}]} {
    %c0_i32 = arith.constant 0 : i32
    %0 = arith.cmpi eq, %arg2, %c0_i32 : i32
    %1 = arith.extui %0 : i1 to i32
    %c0_i32_0 = arith.constant 0 : i32
    %2 = arith.cmpi ne, %1, %c0_i32_0 : i32
    scf.if %2 {
      %cst_14 = arith.constant -3.40282347E+38 : f32
      %20 = vector.broadcast %cst_14 : f32 to vector<2x32xf32>
      %c0_15 = arith.constant 0 : index
      %c0_16 = arith.constant 0 : index
      %21 = vector.load %arg6[%c0_15, %c0_16] : memref<2x32xf32, #tpu.memory_space<vmem>>, vector<2x32xf32>
      tpu.vector_store %arg6[%c0_15, %c0_16], %20 {strides = array<i32>} : memref<2x32xf32, #tpu.memory_space<vmem>>, vector<2x32xf32>,
    } else {
    }
    %c0 = arith.constant 0 : index
    %c0_1 = arith.constant 0 : index
    %c0_2 = arith.constant 0 : index
    %3 = vector.load %arg3[%c0, %c0_1, %c0_2] : memref<2x8x32xf32, #tpu.memory_space<vmem>>, vector<2x8x32xf32>
    %4 = arith.cmpf oeq, %3, %3 : vector<2x8x32xf32>
    %c0_3 = arith.constant 0 : index
    %c0_4 = arith.constant 0 : index
    %c0_5 = arith.constant 0 : index
    %5 = vector.load %arg4[%c0_3, %c0_4, %c0_5] : memref<2x8x1xf32, #tpu.memory_space<vmem>>, vector<2x8x1xf32>
    %cst = arith.constant 0.000000e+00 : f32
    %6 = vector.broadcast %cst : f32 to vector<2x8x1xf32>
    %7 = arith.cmpf ogt, %5, %6 : vector<2x8x1xf32>
    %8 = vector.shape_cast %7 : vector<2x8x1xi1> to vector<2x8x1xi1>
    %9 = vector.broadcast %8 : vector<2x8x1xi1> to vector<2x8x32xi1>
    %10 = arith.andi %4, %9 : vector<2x8x32xi1>
    %cst_6 = arith.constant -3.40282347E+38 : f32
    %11 = vector.broadcast %cst_6 : f32 to vector<2x8x32xf32>
    %12 = arith.select %10, %3, %11 : vector<2x8x32xi1>, vector<2x8x32xf32>
    %c0_7 = arith.constant 0 : index
    %c0_8 = arith.constant 0 : index
    %13 = vector.load %arg6[%c0_7, %c0_8] : memref<2x32xf32, #tpu.memory_space<vmem>>, vector<2x32xf32>
    %cst_9 = arith.constant dense<0xFF800000> : vector<2x32xf32>
    %14 = vector.multi_reduction <maximumf>, %12, %cst_9 [1] : vector<2x8x32xf32> to vector<2x32xf32>
    %15 = arith.maximumf %13, %14 : vector<2x32xf32>
    %c0_10 = arith.constant 0 : index
    %c0_11 = arith.constant 0 : index
    %16 = vector.load %arg6[%c0_10, %c0_11] : memref<2x32xf32, #tpu.memory_space<vmem>>, vector<2x32xf32>
    tpu.vector_store %arg6[%c0_10, %c0_11], %15 {strides = array<i32>} : memref<2x32xf32, #tpu.memory_space<vmem>>, vector<2x32xf32>,
    %c0_i32_12 = arith.constant 0 : i32
    %17 = arith.cmpi eq, %arg2, %c0_i32_12 : i32
    %18 = arith.extui %17 : i1 to i32
    %c0_i32_13 = arith.constant 0 : i32
    %19 = arith.cmpi ne, %18, %c0_i32_13 : i32
    scf.if %19 {
      %c0_14 = arith.constant 0 : index
      %c0_15 = arith.constant 0 : index
      %20 = vector.load %arg6[%c0_14, %c0_15] : memref<2x32xf32, #tpu.memory_space<vmem>>, vector<2x32xf32>
      %c0_16 = arith.constant 0 : index
      %c0_17 = arith.constant 0 : index
      %21 = vector.load %arg5[%c0_16, %c0_17] : memref<2x32xf32, #tpu.memory_space<vmem>>, vector<2x32xf32>
      tpu.vector_store %arg5[%c0_16, %c0_17], %20 {strides = array<i32>} : memref<2x32xf32, #tpu.memory_space<vmem>>, vector<2x32xf32>,
    } else {
    }
    return
  }
  func.func @transform_0(%arg0: i32, %arg1: i32, %arg2: i32) -> (i32, i32, i32) {
    %c0_i32 = arith.constant 0 : i32
    return %arg0, %arg2, %arg1 : i32, i32, i32
  }
  func.func @transform_1(%arg0: i32, %arg1: i32, %arg2: i32) -> (i32, i32, i32) {
    %c0_i32 = arith.constant 0 : i32
    %c0_i32_0 = arith.constant 0 : i32
    return %arg0, %arg2, %c0_i32 : i32, i32, i32
  }
  func.func @transform_2(%arg0: i32, %arg1: i32, %arg2: i32) -> (i32, i32) {
    %c0_i32 = arith.constant 0 : i32
    return %arg0, %arg1 : i32, i32
  }
}

</mosaic_0001>

<bundles_post_ra>
// kernel: tpu_custom_call.1
= control target key start
LH: loop header
LB: loop body
LE: loop exit
PB: predicated region body
PF: predicated region fallthrough
CT: control target
= control target key end

     0   :  { %s156_s0 = inlined_call_operand.vmem [shape: f32[2,8,32], index: 0, kind: input, shape index: {}]   ;;  %s157_s1 = inlined_call_operand.vmem [shape: f32[2,8,1], index: 1, kind: input, shape index: {}]   ;;  %s158_s2 = inlined_call_operand.hbm [shape: f32[2,32], index: 2, kind: output, shape index: {}]  }
   0x1   :  { %v22_v0 = vld [vmem:[%s157_s1] sm:$0xff]  ;;  %v23_v1 = vld [vmem:[%s157_s1 + $0x8] sm:$0xff] }
   0x2   :  { %7 = vsyncpa [#allocation4], 0  ;;  %v111_v2 = vmov 0   ;;  %vm24_vm0 = vcmp.gt.f32.partialorder %v22_v0, 0.0  ;;  %vm25_vm1 = vcmp.gt.f32.partialorder %v23_v1, 0.0  ;;  %vm16_vm2 = vcmask 254976  }
   0x3   :  { %86 = vset.pattern.permute.xlu0 %v111_v2  ;;  %v26_v3 = vsel %vm24_vm0, 1, %v111_v2  ;;  %v27_v4 = vsel %vm25_vm1, 1, %v111_v2  ;;  %v112_v5 = vmov -3.4028235e+38   ;;  %v18_v6 = vld [vmem:[%s156_s0] sm:$0xff]  ;;  %v19_v8 = vld [vmem:[%s156_s0 + $0x8] sm:$0xff] }
   0x4   :  { %29 = vperm.xlu0 %86, %v26_v3   ;;  %17 = vst.msk [vmem:[#allocation2] sm:$0x3] %vm16_vm2, %v112_v5  ;;  %vm20_vm3 = vcmp.eq.f32.partialorder %v18_v6, %v18_v6  ;;  %vm41_vm4 = vcmask 261120   ;;  %vm21_vm7 = vcmp.eq.f32.partialorder %v19_v8, %v19_v8  ;;  %vm58_vm10 = vcmask 1041409   ;;  %s113_s0 = smov [#allocation3]  }
   0x5   :  { %s75_s16 = sshll.u32 %s113_s0, 4  ;;  %s76_s16 = int_to_ptr.vmem [resolvable:$true] %s75_s16 }
   0x6   :  { %s87_s17 = scalar_lea.vmem %s76_s16, 32  ;;  %p92_p1 = scmp.lt.s32.totalorder %s76_s16, %s76_s16 }
   0x7   :  { %p88_p0 = scmp.ne.s32.totalorder %s76_s16, %s87_s17  ;;  %p93_p2 = scmp.lt.s32.totalorder %s87_s17, %s87_s17 }
   0x8   :  { %32 = vperm.xlu0 %86, %v27_v4  }
   0x9   :  { %p94_p3 = por %p93_p2, %p92_p1 }
   0xb   :  { %v40_v26 = vld [vmem:[#allocation2] sm:$0x3]  ;;  %p95_p4 = pnand %p94_p3, %p88_p0 }
  0x83   :  { %v30_v7 = vpop.permute.xlu0 %29 }
  0x84   :  { %vm34_vm5 = vcmp.eq.s32.totalorder %v30_v7, 1 }
  0x85   :  { %vm36_vm6 = vmand %vm20_vm3, %vm34_vm5 }
  0x86   :  { %v38_v9 = vsel %vm36_vm6, %v18_v6, -3.4028235e+38 }
  0x87   :  { %v42_v10 = vsel %vm41_vm4, %v38_v9, -inf  ;;  %v33_v11 = vpop.permute.xlu0 %32 }
  0x88   :  { %v43_v12 = vrot.slane %v42_v10, 4  ;;  %vm35_vm8 = vcmp.eq.s32.totalorder %v33_v11, 1 }
  0x89   :  { %vm37_vm9 = vmand %vm21_vm7, %vm35_vm8 }
  0x8a   :  { %v44_v13 = vmax.f32 %v42_v10, %v43_v12  ;;  %v39_v14 = vsel %vm37_vm9, %v19_v8, -3.4028235e+38 }
  0x8b   :  { %v49_v15 = vsel %vm41_vm4, %v39_v14, -inf }
  0x8c   :  { %v45_v16 = vrot.slane %v44_v13, 2  ;;  %v50_v17 = vrot.slane %v49_v15, 4 }
  0x8e   :  { %v46_v18 = vmax.f32 %v44_v13, %v45_v16  ;;  %v51_v19 = vmax.f32 %v49_v15, %v50_v17 }
  0x90   :  { %v52_v20 = vrot.slane %v51_v19, 2  ;;  %v47_v21 = vrot.slane %v46_v18, 1 }
  0x92   :  { %v53_v22 = vmax.f32 %v51_v19, %v52_v20  ;;  %v48_v24 = vmax.f32 %v46_v18, %v47_v21 }
  0x94   :  { %v54_v23 = vrot.slane %v53_v22, 1 }
  0x96   :  { %v55_v25 = vmax.f32 %v53_v22, %v54_v23 }
  0x98   :  { %v59_v27 = vsel %vm58_vm10, %v55_v25, %v48_v24 }
  0x99   :  { %v61_v28 = vmax.f32 %v40_v26, %v59_v27 }
  0x9b   :  { %63 = vst.msk [vmem:[#allocation2] sm:$0x3] %vm16_vm2, %v61_v28 }
  0xa2   :  { %v67_v29 = vld [vmem:[#allocation2] sm:$0x3] }
  0xa3   :  { %68 = vst.msk [vmem:[#allocation3] sm:$0x3] %vm16_vm2, %v67_v29 }
  0xa4   :  { %98 = shalt.err (!%p95_p4)
}
  0xa5   :  { %s99_s20 = scalar_lea.hbm %s158_s2, 32 }
  0xa6   :  { %p100_p5 = scmp.ne.s32.totalorder %s158_s2, %s99_s20  ;;  %p103_p6 = scmp.lt.u32.totalorder %s99_s20, %s158_s2 }
  0xa8   :  { %p105_p7 = pnand %p103_p6, %p100_p5 }
  0xaa   :  { %108 = shalt.err (!%p105_p7)
}
  0xab   :  { %78 = dma.vmem_to_hbm [thread:$0]  %s76_s16, 32, %s158_s2, [#allocation4]  }
  0xac   :  { %109 = dma.done.wait [#allocation4], 32  }
  0xad   :  { %110 = vsyncadd [#allocation4], 4294967264 }
  0xae   :  { %82 = vsyncpa [#allocation4], 1 }

</bundles_post_ra>
